<compile_context>
chip_gen: v5e
topology: v5e:2x2
jax: 0.10.0
libtpu: 0.0.40
codegen_flags: <defaults>
</compile_context>

<pallas_src>
import jax
import jax.numpy as jnp
import numpy as np
from jax.experimental import pallas as pl
from jax.experimental.pallas import tpu as pltpu


SUBLANE = 8      # f32 sublane granule
LANE = 128       # lane granule


def _round_up(x, m):
    return ((x + m - 1) // m) * m


# ----------------------------------------------------------------------------
# Pallas kernel: one invocation, all heads fused.
# ----------------------------------------------------------------------------
def _make_kernel(return_type: str, tau: float, slate_size: int, a_pad: int):
    inv_tau = 1.0 / float(tau)

    def kernel(state_ref, abs_ref, w1a_ref, w1b_ref, b1_ref,
               wh_ref, bh_ref, g_ref, mask_ref, out_ref):
        # Shared hidden activation: relu(concat(state, abstraction) @ W1 + b1)
        # with W1 split row-wise so no concatenation is needed.
        h = (jnp.dot(state_ref[...], w1a_ref[...],
                     preferred_element_type=jnp.float32)
             + jnp.dot(abs_ref[...], w1b_ref[...],
                       preferred_element_type=jnp.float32)
             + b1_ref[...])
        x = jnp.maximum(h, 0.0)                                  # [B, H]

        # All slate heads in one MXU pass: [B, H] @ [H, L*A_pad]
        logits = jnp.dot(x, wh_ref[...],
                         preferred_element_type=jnp.float32) + bh_ref[...]

        # Gumbel-softmax (soft, tau): softmax((logits + g) / tau) per head.
        z = (logits + g_ref[...]) * inv_tau                      # [B, L*A_pad]
        # Mask padded columns with a large negative (avoids -inf/NaN entirely).
        z = jnp.where(mask_ref[...] > 0.0, z, -1e30)

        # Per-head masked softmax on static, lane-aligned 128-wide slices.
        for l in range(slate_size):
            lo = l * a_pad
            hi = lo + a_pad
            zl = z[:, lo:hi]                                     # [B, A_pad]
            m = jnp.max(zl, axis=-1, keepdims=True)
            e = jnp.exp(zl - m)                                  # padded -> 0
            s = jnp.sum(e, axis=-1, keepdims=True)
            if return_type == "log_prob":
                # direct log-softmax: better numerics, one log on [B, 1]
                out_ref[:, lo:hi] = (zl - m) - jnp.log(s)
            else:  # "prob"
                out_ref[:, lo:hi] = e * pl.reciprocal(s, approx=True)
        # TODO(synk): the PyTorch `else` branch (hard=True straight-through) is
        # buggy in the reference source (`hard=True` passed to list.append);
        # only 'log_prob' and 'prob' are implemented here.

    return kernel


# ----------------------------------------------------------------------------
# Wrapper
# ----------------------------------------------------------------------------
def discrete_slate_decoder_forward(state, abstraction, params,
                                   n_unique_actions, gumbel_noise_packed,
                                   return_type="log_prob", tau=1.0):
    """Returns a list (length slate_size) of [B, n_unique_actions[l]] arrays.

    gumbel_noise_packed must be [B_pad, slate_size * A_pad] (packed layout,
    B_pad = batch rounded up to 8, A_pad = per-head vocab padded to 128).
    """
    w1a, w1b, b1, wh, bh, mask = params
    L = len(n_unique_actions)
    H = wh.shape[0]
    a_pad = wh.shape[1] // L

    state = state.astype(jnp.float32)
    abstraction = abstraction.astype(jnp.float32)
    B = state.shape[0]
    B_pad = _round_up(max(B, SUBLANE), SUBLANE)
    if B_pad != B:
        state = jnp.pad(state, ((0, B_pad - B), (0, 0)))
        abstraction = jnp.pad(abstraction, ((0, B_pad - B), (0, 0)))

    assert gumbel_noise_packed.shape == (B_pad, L * a_pad)

    kernel = _make_kernel(return_type, float(tau), L, a_pad)

    vmem = pl.BlockSpec(memory_space=pltpu.MemorySpace.VMEM)
    out = pl.pallas_call(
        kernel,
        out_shape=jax.ShapeDtypeStruct((B_pad, L * a_pad), jnp.float32),
        in_specs=[vmem] * 9,
        out_specs=vmem,
    )(state, abstraction, w1a, w1b, b1, wh, bh, gumbel_noise_packed, mask)

    return [out[:B, l * a_pad: l * a_pad + int(n_unique_actions[l])]
            for l in range(L)]


# ----------------------------------------------------------------------------
# Deterministic parameter initialization (mimics nn.Linear uniform init),
# pre-packed once into the fused / lane-dense layout.
# ----------------------------------------------------------------------------
def init_params(key, dim_context, n_latent, hidden_dim, n_unique_actions):
    L = len(n_unique_actions)
    A_max = int(max(n_unique_actions))
    a_pad = _round_up(A_max, LANE)
    Din = dim_context + n_latent

    keys = jax.random.split(key, 2 + 2 * L)
    lim1 = 1.0 / np.sqrt(Din)
    w1 = jax.random.uniform(keys[0], (Din, hidden_dim), jnp.float32, -lim1, lim1)
    b1 = jax.random.uniform(keys[1], (hidden_dim,), jnp.float32, -lim1, lim1)
    w1a = w1[:dim_context]          # [dim_context, H]
    w1b = w1[dim_context:]          # [n_latent,   H]

    lim2 = 1.0 / np.sqrt(hidden_dim)
    wh = np.zeros((hidden_dim, L * a_pad), np.float32)
    bh = np.zeros((1, L * a_pad), np.float32)
    mask = np.zeros((1, L * a_pad), np.float32)
    for l in range(L):
        a = int(n_unique_actions[l])
        w = jax.random.uniform(keys[2 + 2 * l], (hidden_dim, a),
                               jnp.float32, -lim2, lim2)
        b = jax.random.uniform(keys[3 + 2 * l], (a,), jnp.float32, -lim2, lim2)
        wh[:, l * a_pad: l * a_pad + a] = np.asarray(w)
        bh[0, l * a_pad: l * a_pad + a] = np.asarray(b)
        mask[0, l * a_pad: l * a_pad + a] = 1.0

    return (w1a, w1b, b1.reshape(1, hidden_dim),
            jnp.asarray(wh), jnp.asarray(bh), jnp.asarray(mask)), a_pad


# ----------------------------------------------------------------------------
# Pure-JAX reference (same gumbel noise) for a correctness check
# ----------------------------------------------------------------------------
def reference_forward(state, abstraction, params, n_unique_actions,
                      gumbel_noise_packed, a_pad,
                      return_type="log_prob", tau=1.0):
    w1a, w1b, b1, wh, bh, _ = params
    B = state.shape[0]
    x = jax.nn.relu(state @ w1a + abstraction @ w1b + b1[0])
    outs = []
    for l in range(len(n_unique_actions)):
        a = int(n_unique_actions[l])
        cols = slice(l * a_pad, l * a_pad + a)
        logits = x @ wh[:, cols] + bh[0, cols]
        z = (logits + gumbel_noise_packed[:B, cols]) / tau
        p = jax.nn.softmax(z, axis=-1)
        outs.append(jnp.log(p) if return_type == "log_prob" else p)
    return outs


# ----------------------------------------------------------------------------
if __name__ == "__main__":
    # Small shapes consistent with the module's forward.
    batch = 4
    dim_context = 16
    n_latent_abstraction = 8
    hidden_dim = 32
    n_unique_actions = np.array([10, 12, 16])   # slate_size = 3, variable sizes
    slate_size = n_unique_actions.shape[0]

    key = jax.random.PRNGKey(0)
    k_param, k_state, k_abs, k_gumbel = jax.random.split(key, 4)

    params, a_pad = init_params(k_param, dim_context, n_latent_abstraction,
                                hidden_dim, n_unique_actions)

    state = jax.random.normal(k_state, (batch, dim_context), jnp.float32)
    abstraction = jax.random.normal(
        k_abs, (batch, n_latent_abstraction), jnp.float32)

    # Gumbel noise sampled once in plain JAX (the stochastic part of the op),
    # generated directly in the packed [B_pad, L*A_pad] layout so the wrapper
    # does no per-call repacking.
    B_pad = _round_up(max(batch, SUBLANE), SUBLANE)
    gumbel_packed = jax.random.gumbel(
        k_gumbel, (B_pad, slate_size * a_pad), jnp.float32)

    # log_prob path (module default)
    outputs = discrete_slate_decoder_forward(
        state, abstraction, params, n_unique_actions, gumbel_packed,
        return_type="log_prob")
    outputs = [jax.block_until_ready(o) for o in outputs]
    refs = reference_forward(state, abstraction, params, n_unique_actions,
                             gumbel_packed, a_pad, return_type="log_prob")
    for o, r in zip(outputs, refs):
        np.testing.assert_allclose(np.asarray(o), np.asarray(r),
                                   rtol=1e-4, atol=1e-4)

    # prob path (approx EUP reciprocal -> slightly looser tolerance)
    outputs_p = discrete_slate_decoder_forward(
        state, abstraction, params, n_unique_actions, gumbel_packed,
        return_type="prob")
    outputs_p = [jax.block_until_ready(o) for o in outputs_p]
    refs_p = reference_forward(state, abstraction, params, n_unique_actions,
                               gumbel_packed, a_pad, return_type="prob")
    for o, r in zip(outputs_p, refs_p):
        np.testing.assert_allclose(np.asarray(o), np.asarray(r),
                                   rtol=2e-3, atol=2e-3)

    print("KERNEL_OK")
</pallas_src>

<mosaic_0001>
module attributes {stable_mosaic.version = 11 : i64} {
  func.func @kernel(%arg0: memref<8x16xf32, #tpu.memory_space<vmem>>, %arg1: memref<8x8xf32, #tpu.memory_space<vmem>>, %arg2: memref<16x32xf32, #tpu.memory_space<vmem>>, %arg3: memref<8x32xf32, #tpu.memory_space<vmem>>, %arg4: memref<1x32xf32, #tpu.memory_space<vmem>>, %arg5: memref<32x384xf32, #tpu.memory_space<vmem>>, %arg6: memref<1x384xf32, #tpu.memory_space<vmem>>, %arg7: memref<8x384xf32, #tpu.memory_space<vmem>>, %arg8: memref<1x384xf32, #tpu.memory_space<vmem>>, %arg9: memref<8x384xf32, #tpu.memory_space<vmem>>) attributes {dimension_semantics = [], scalar_prefetch = 0 : i64, scratch_operands = 0 : i64, tpu.core_type = #tpu.core_type<tc>} {
    %c0 = arith.constant 0 : index
    %c0_0 = arith.constant 0 : index
    %0 = vector.load %arg0[%c0, %c0_0] : memref<8x16xf32, #tpu.memory_space<vmem>>, vector<8x16xf32>
    %c0_1 = arith.constant 0 : index
    %c0_2 = arith.constant 0 : index
    %1 = vector.load %arg2[%c0_1, %c0_2] : memref<16x32xf32, #tpu.memory_space<vmem>>, vector<16x32xf32>
    %cst = arith.constant dense<0.000000e+00> : vector<8x32xf32>
    %2 = tpu.matmul %0, %1, %cst {dimension_numbers = #tpu.dot_dimension_numbers<[1], [0], [0], [1], [0, 0, 1, 1], [], []>} : vector<8x16xf32>, vector<16x32xf32>, vector<8x32xf32> -> vector<8x32xf32>
    %c0_3 = arith.constant 0 : index
    %c0_4 = arith.constant 0 : index
    %3 = vector.load %arg1[%c0_3, %c0_4] : memref<8x8xf32, #tpu.memory_space<vmem>>, vector<8x8xf32>
    %c0_5 = arith.constant 0 : index
    %c0_6 = arith.constant 0 : index
    %4 = vector.load %arg3[%c0_5, %c0_6] : memref<8x32xf32, #tpu.memory_space<vmem>>, vector<8x32xf32>
    %cst_7 = arith.constant dense<0.000000e+00> : vector<8x32xf32>
    %5 = tpu.matmul %3, %4, %cst_7 {dimension_numbers = #tpu.dot_dimension_numbers<[1], [0], [0], [1], [0, 0, 1, 1], [], []>} : vector<8x8xf32>, vector<8x32xf32>, vector<8x32xf32> -> vector<8x32xf32>
    %6 = arith.addf %2, %5 : vector<8x32xf32>
    %c0_8 = arith.constant 0 : index
    %c0_9 = arith.constant 0 : index
    %7 = vector.load %arg4[%c0_8, %c0_9] : memref<1x32xf32, #tpu.memory_space<vmem>>, vector<1x32xf32>
    %8 = vector.broadcast %7 : vector<1x32xf32> to vector<8x32xf32>
    %9 = arith.addf %6, %8 : vector<8x32xf32>
    %cst_10 = arith.constant 0.000000e+00 : f32
    %10 = vector.broadcast %cst_10 : f32 to vector<8x32xf32>
    %11 = arith.maximumf %9, %10 : vector<8x32xf32>
    %c0_11 = arith.constant 0 : index
    %c0_12 = arith.constant 0 : index
    %12 = vector.load %arg5[%c0_11, %c0_12] : memref<32x384xf32, #tpu.memory_space<vmem>>, vector<32x384xf32>
    %cst_13 = arith.constant dense<0.000000e+00> : vector<8x384xf32>
    %13 = tpu.matmul %11, %12, %cst_13 {dimension_numbers = #tpu.dot_dimension_numbers<[1], [0], [0], [1], [0, 0, 1, 1], [], []>} : vector<8x32xf32>, vector<32x384xf32>, vector<8x384xf32> -> vector<8x384xf32>
    %c0_14 = arith.constant 0 : index
    %c0_15 = arith.constant 0 : index
    %14 = vector.load %arg6[%c0_14, %c0_15] : memref<1x384xf32, #tpu.memory_space<vmem>>, vector<1x384xf32>
    %15 = vector.broadcast %14 : vector<1x384xf32> to vector<8x384xf32>
    %16 = arith.addf %13, %15 : vector<8x384xf32>
    %c0_16 = arith.constant 0 : index
    %c0_17 = arith.constant 0 : index
    %17 = vector.load %arg7[%c0_16, %c0_17] : memref<8x384xf32, #tpu.memory_space<vmem>>, vector<8x384xf32>
    %18 = arith.addf %16, %17 : vector<8x384xf32>
    %cst_18 = arith.constant 1.000000e+00 : f32
    %19 = vector.broadcast %cst_18 : f32 to vector<8x384xf32>
    %20 = arith.mulf %18, %19 : vector<8x384xf32>
    %c0_19 = arith.constant 0 : index
    %c0_20 = arith.constant 0 : index
    %21 = vector.load %arg8[%c0_19, %c0_20] : memref<1x384xf32, #tpu.memory_space<vmem>>, vector<1x384xf32>
    %cst_21 = arith.constant 0.000000e+00 : f32
    %22 = vector.broadcast %cst_21 : f32 to vector<1x384xf32>
    %23 = arith.cmpf ogt, %21, %22 : vector<1x384xf32>
    %cst_22 = arith.constant -1.000000e+30 : f32
    %24 = vector.shape_cast %23 : vector<1x384xi1> to vector<1x384xi1>
    %25 = vector.broadcast %24 : vector<1x384xi1> to vector<8x384xi1>
    %26 = vector.broadcast %cst_22 : f32 to vector<8x384xf32>
    %27 = arith.select %25, %20, %26 : vector<8x384xi1>, vector<8x384xf32>
    %28 = vector.extract_strided_slice %27 {offsets = [0, 0], sizes = [8, 128], strides = [1, 1]} : vector<8x384xf32> to vector<8x128xf32>
    %cst_23 = arith.constant dense<0xFF800000> : vector<8xf32>
    %29 = vector.multi_reduction <maximumf>, %28, %cst_23 [1] : vector<8x128xf32> to vector<8xf32>
    %30 = vector.shape_cast %29 : vector<8xf32> to vector<8x1xf32>
    %31 = vector.broadcast %30 : vector<8x1xf32> to vector<8x128xf32>
    %32 = arith.subf %28, %31 : vector<8x128xf32>
    %33 = math.exp %32 : vector<8x128xf32>
    %cst_24 = arith.constant dense<0.000000e+00> : vector<8xf32>
    %34 = vector.multi_reduction <add>, %33, %cst_24 [1] : vector<8x128xf32> to vector<8xf32>
    %35 = vector.shape_cast %34 : vector<8xf32> to vector<8x1xf32>
    %36 = vector.broadcast %30 : vector<8x1xf32> to vector<8x128xf32>
    %37 = arith.subf %28, %36 : vector<8x128xf32>
    %38 = math.log %35 : vector<8x1xf32>
    %39 = vector.broadcast %38 : vector<8x1xf32> to vector<8x128xf32>
    %40 = arith.subf %37, %39 : vector<8x128xf32>
    %c0_25 = arith.constant 0 : index
    %c0_26 = arith.constant 0 : index
    %41 = vector.load %arg9[%c0_25, %c0_26] : memref<8x384xf32, #tpu.memory_space<vmem>>, vector<8x128xf32>
    tpu.vector_store %arg9[%c0_25, %c0_26], %40 {strides = array<i32>} : memref<8x384xf32, #tpu.memory_space<vmem>>, vector<8x128xf32>,
    %42 = vector.extract_strided_slice %27 {offsets = [0, 128], sizes = [8, 128], strides = [1, 1]} : vector<8x384xf32> to vector<8x128xf32>
    %cst_27 = arith.constant dense<0xFF800000> : vector<8xf32>
    %43 = vector.multi_reduction <maximumf>, %42, %cst_27 [1] : vector<8x128xf32> to vector<8xf32>
    %44 = vector.shape_cast %43 : vector<8xf32> to vector<8x1xf32>
    %45 = vector.broadcast %44 : vector<8x1xf32> to vector<8x128xf32>
    %46 = arith.subf %42, %45 : vector<8x128xf32>
    %47 = math.exp %46 : vector<8x128xf32>
    %cst_28 = arith.constant dense<0.000000e+00> : vector<8xf32>
    %48 = vector.multi_reduction <add>, %47, %cst_28 [1] : vector<8x128xf32> to vector<8xf32>
    %49 = vector.shape_cast %48 : vector<8xf32> to vector<8x1xf32>
    %50 = vector.broadcast %44 : vector<8x1xf32> to vector<8x128xf32>
    %51 = arith.subf %42, %50 : vector<8x128xf32>
    %52 = math.log %49 : vector<8x1xf32>
    %53 = vector.broadcast %52 : vector<8x1xf32> to vector<8x128xf32>
    %54 = arith.subf %51, %53 : vector<8x128xf32>
    %c0_29 = arith.constant 0 : index
    %c128 = arith.constant 128 : index
    %55 = vector.load %arg9[%c0_29, %c128] : memref<8x384xf32, #tpu.memory_space<vmem>>, vector<8x128xf32>
    tpu.vector_store %arg9[%c0_29, %c128], %54 {strides = array<i32>} : memref<8x384xf32, #tpu.memory_space<vmem>>, vector<8x128xf32>,
    %56 = vector.extract_strided_slice %27 {offsets = [0, 256], sizes = [8, 128], strides = [1, 1]} : vector<8x384xf32> to vector<8x128xf32>
    %cst_30 = arith.constant dense<0xFF800000> : vector<8xf32>
    %57 = vector.multi_reduction <maximumf>, %56, %cst_30 [1] : vector<8x128xf32> to vector<8xf32>
    %58 = vector.shape_cast %57 : vector<8xf32> to vector<8x1xf32>
    %59 = vector.broadcast %58 : vector<8x1xf32> to vector<8x128xf32>
    %60 = arith.subf %56, %59 : vector<8x128xf32>
    %61 = math.exp %60 : vector<8x128xf32>
    %cst_31 = arith.constant dense<0.000000e+00> : vector<8xf32>
    %62 = vector.multi_reduction <add>, %61, %cst_31 [1] : vector<8x128xf32> to vector<8xf32>
    %63 = vector.shape_cast %62 : vector<8xf32> to vector<8x1xf32>
    %64 = vector.broadcast %58 : vector<8x1xf32> to vector<8x128xf32>
    %65 = arith.subf %56, %64 : vector<8x128xf32>
    %66 = math.log %63 : vector<8x1xf32>
    %67 = vector.broadcast %66 : vector<8x1xf32> to vector<8x128xf32>
    %68 = arith.subf %65, %67 : vector<8x128xf32>
    %c0_32 = arith.constant 0 : index
    %c256 = arith.constant 256 : index
    %69 = vector.load %arg9[%c0_32, %c256] : memref<8x384xf32, #tpu.memory_space<vmem>>, vector<8x128xf32>
    tpu.vector_store %arg9[%c0_32, %c256], %68 {strides = array<i32>} : memref<8x384xf32, #tpu.memory_space<vmem>>, vector<8x128xf32>,
    return
  }
}

</mosaic_0001>

<bundles_post_ra>
// kernel: tpu_custom_call.1
= control target key start
LH: loop header
LB: loop body
LE: loop exit
PB: predicated region body
PF: predicated region fallthrough
CT: control target
= control target key end

     0   :  { %14 = vsyncpa [#allocation3], 0  ;;  %s672_s0 = inlined_call_operand.hbm [shape: f32[8,16], index: 0, kind: input, shape index: {}]   ;;  %s673_s1 = inlined_call_operand.hbm [shape: f32[8,8], index: 1, kind: input, shape index: {}]   ;;  %s674_s2 = inlined_call_operand.hbm [shape: f32[16,32], index: 2, kind: input, shape index: {}]   ;;  %s675_s3 = inlined_call_operand.hbm [shape: f32[8,32], index: 3, kind: input, shape index: {}]   ;;  %s676_s4 = inlined_call_operand.hbm [shape: f32[1,32], index: 4, kind: input, shape index: {}]   ;;  %s677_s5 = inlined_call_operand.hbm [shape: f32[32,384], index: 5, kind: input, shape index: {}]   ;;  %s678_s6 = inlined_call_operand.vmem [shape: f32[1,384], index: 6, kind: input, shape index: {}]   ;;  %s679_s7 = inlined_call_operand.hbm [shape: f32[8,384], index: 7, kind: input, shape index: {}]   ;;  %s680_s8 = inlined_call_operand.vmem [shape: f32[1,384], index: 8, kind: input, shape index: {}]   ;;  %s681_s9 = inlined_call_operand.hbm [shape: f32[8,384], index: 9, kind: output, shape index: {}]  }
   0x1   :  { %15 = vsyncpa [#allocation6], 0 }
   0x2   :  { %16 = vsyncpa [#allocation9], 0 }
   0x3   :  { %17 = vsyncpa [#allocation12], 0  ;;  %s35_s11 = sshll.u32 %s673_s1, 4  ;;  %s36_s11 = int_to_ptr.hbm [resolvable:$true] %s35_s11 }
   0x4   :  { %18 = vsyncpa [#allocation4], 0  ;;  %s579_s12 = smov [#allocation5]   ;;  %s59_s16 = sshll.u32 %s675_s3, 4  ;;  %s60_s16 = int_to_ptr.hbm [resolvable:$true] %s59_s16 }
   0x5   :  { %s37_s13 = sshll.u32 %s579_s12, 4  ;;  %s580_s17 = smov [#allocation8]   ;;  %s38_s13 = int_to_ptr.vmem [resolvable:$true] %s37_s13 }
   0x6   :  { %40 = dma.hbm_to_vmem [thread:$0]  %s36_s11, 128, %s38_s13, [#allocation6]  }
   0x7   :  { %s61_s18 = sshll.u32 %s580_s17, 4  ;;  %s80_s21 = sshll.u32 %s677_s5, 4  ;;  %s62_s18 = int_to_ptr.vmem [resolvable:$true] %s61_s18  ;;  %s81_s21 = int_to_ptr.hbm [resolvable:$true] %s80_s21 }
   0x8   :  { %64 = dma.hbm_to_vmem [thread:$0]  %s60_s16, 128, %s62_s18, [#allocation9]  }
   0x9   :  { %s581_s1 = smov [#allocation11]   ;;  %s24_s25 = sshll.u32 %s672_s0, 4  ;;  %s25_s25 = int_to_ptr.hbm [resolvable:$true] %s24_s25 }
   0xa   :  { %s82_s22 = sshll.u32 %s581_s1, 4  ;;  %s582_s26 = smov 384   ;;  %s83_s22 = int_to_ptr.vmem [resolvable:$true] %s82_s22 }
   0xb   :  { %s583_s3 = smov 24   ;;  %s584_s27 = smov [#allocation2]  }
   0xc   :  { %88 = dma.hbm_to_vmem [thread:$0]  %s81_s21, 1536, %s83_s22, [#allocation12], %s582_s26, %s582_s26, %s583_s3  }
   0xd   :  { %s26_s28 = sshll.u32 %s584_s27, 4  ;;  %s45_s5 = sshll.u32 %s674_s2, 4  ;;  %s27_s28 = int_to_ptr.vmem [resolvable:$true] %s26_s28  ;;  %s46_s5 = int_to_ptr.hbm [resolvable:$true] %s45_s5 }
   0xe   :  { %29 = dma.hbm_to_vmem [thread:$0]  %s25_s25, 128, %s27_s28, [#allocation3]  }
   0xf   :  { %s585_s10 = smov [#allocation7]   ;;  %s70_s0 = sshll.u32 %s676_s4, 4  ;;  %s71_s0 = int_to_ptr.hbm [resolvable:$true] %s70_s0 }
  0x10   :  { %s47_s11 = sshll.u32 %s585_s10, 4  ;;  %s586_s14 = smov 128   ;;  %s48_s11 = int_to_ptr.vmem [resolvable:$true] %s47_s11 }
  0x11   :  { %s587_s15 = smov 8   ;;  %s588_s16 = smov [#allocation10]  }
  0x12   :  { %53 = dma.hbm_to_vmem [thread:$0]  %s46_s5, 256, %s48_s11, [#allocation6], %s586_s14, %s586_s14, %s587_s15  }
  0x13   :  { %s72_s17 = sshll.u32 %s588_s16, 4  ;;  %s96_s2 = sshll.u32 %s679_s7, 4  ;;  %s73_s17 = int_to_ptr.vmem [resolvable:$true] %s72_s17  ;;  %s97_s2 = int_to_ptr.hbm [resolvable:$true] %s96_s2 }
  0x14   :  { %75 = dma.hbm_to_vmem [thread:$0]  %s71_s0, 16, %s73_s17, [#allocation9]  }
  0x15   :  { %s589_s20 = smov [#allocation13]  }
  0x16   :  { %s98_s21 = sshll.u32 %s589_s20, 4  ;;  %s99_s21 = int_to_ptr.vmem [resolvable:$true] %s98_s21 }
  0x17   :  { %101 = dma.hbm_to_vmem [thread:$0]  %s97_s2, 384, %s99_s21, [#allocation12]  }
  0x18   :  { %569 = dma.done.wait [#allocation3], 128  }
  0x19   :  { %570 = vsyncadd [#allocation3], 4294967168 }
  0x1a   :  { %571 = dma.done.wait [#allocation6], 384  }
  0x1b   :  { %572 = vsyncadd [#allocation6], 4294966912 }
  0x1c   :  { %573 = dma.done.wait [#allocation9], 144  }
  0x1d   :  { %574 = vsyncadd [#allocation9], 4294967152 }
  0x1e   :  { %575 = dma.done.wait [#allocation12], 1920  }
  0x1f   :  { %576 = vsyncadd [#allocation12], 4294965376  ;;  %vm137_vm0 = vcmask 64512   ;;  %v134_v0 = vld [vmem:[#allocation7 + $0x8] sm:$0xff]  ;;  %v136_v1 = vld [vmem:[#allocation8] sm:$0xff]  ;;  %vm161_vm1 = vcmask 130048  }
  0x20   :  { %v133_v2 = vld [vmem:[#allocation7] sm:$0xff]  ;;  %179 = vmatpush.msra.mxu1 %v134_v0  ;;  %156 = vmatpush.msra.mxu0 %v136_v1  ;;  %v135_v3 = vld [vmem:[#allocation5] sm:$0xff]  ;;  %v132_v4 = vld [vmem:[#allocation2] sm:$0xff]  ;;  %vm211_vm2 = vcmask 261120   ;;  %v590_v25 = vmov 0   ;;  %s333_s25 = sshll.u32 %s681_s9, 4  ;;  %s334_s25 = int_to_ptr.hbm [resolvable:$true] %s333_s25 }
  0x21   :  { %346 = vmatmul.msk.f32.vlgmr.msra.gmra.mxu0 %vm137_vm0, %v135_v3  ;;  %v200_v5 = vld [vmem:[#allocation11 + $0x48] sm:$0xff]  ;;  %v201_v6 = vld [vmem:[#allocation11 + $0x50] sm:$0xff]  ;;  %v202_v7 = vld [vmem:[#allocation11 + $0x58] sm:$0xff] }
  0x22   :  { %180 = vmatpush.msra.mxu1 %v133_v2  ;;  %227 = vmatpush.msra.mxu2 %v200_v5  ;;  %v197_v8 = vld [vmem:[#allocation11 + $0x30] sm:$0xff]  ;;  %v198_v9 = vld [vmem:[#allocation11 + $0x38] sm:$0xff]  ;;  %v199_v10 = vld [vmem:[#allocation11 + $0x40] sm:$0xff] }
  0x23   :  { %347 = vmatmul.msk.f32.vlgmr.msra.gmra.mxu1 %vm161_vm1, %v132_v4  ;;  %247 = vmatpush.msra.mxu3 %v201_v6  ;;  %v194_v11 = vld [vmem:[#allocation11 + $0x18] sm:$0xff]  ;;  %v195_v12 = vld [vmem:[#allocation11 + $0x20] sm:$0xff]  ;;  %v196_v13 = vld [vmem:[#allocation11 + $0x28] sm:$0xff] }
  0x24   :  { %267 = vmatpush.msrb.mxu0 %v202_v7  ;;  %228 = vmatpush.msra.mxu2 %v197_v8  ;;  %v191_v14 = vld [vmem:[#allocation11] sm:$0xff]  ;;  %v192_v15 = vld [vmem:[#allocation11 + $0x8] sm:$0xff]  ;;  %v193_v16 = vld [vmem:[#allocation11 + $0x10] sm:$0xff] }
  0x25   :  { %248 = vmatpush.msra.mxu3 %v198_v9  ;;  %v364_v18 = vld [vmem:[#allocation10] ss:$0 sm:$0xff]  ;;  %v281_v23 = vld [vmem:[%s680_s8] sm:$0x7]  ;;  %v275_v37 = vld [vmem:[#allocation13] sm:$0xff] }
  0x26   :  { %268 = vmatpush.msrb.mxu0 %v199_v10  ;;  %229 = vmatpush.msra.mxu2 %v194_v11  ;;  %vm282_vm3 = vcmp.gt.f32.partialorder %v281_v23, 0.0  ;;  %v203_v24 = vld [vmem:[%s678_s6] sm:$0x7]  ;;  %v276_v44 = vld [vmem:[#allocation13 + $0x8] sm:$0xff]  ;;  %s591_s6 = smov [#allocation14]  }
  0x27   :  { %249 = vmatpush.msra.mxu3 %v195_v12  ;;  %v283_v26 = vsel %vm282_vm3, 1, %v590_v25  ;;  %v207_v27 = vperm.slane %v203_v24, 2  ;;  %v277_v30 = vld [vmem:[#allocation13 + $0x10] sm:$0xff]  ;;  %v205_v32 = vperm.slane %v203_v24, 0  ;;  %v206_v39 = vperm.slane %v203_v24, 1  ;;  %s331_s8 = sshll.u32 %s591_s6, 4  ;;  %s332_s8 = int_to_ptr.vmem [resolvable:$true] %s331_s8 }
  0x28   :  { %269 = vmatpush.msrb.mxu0 %v196_v13  ;;  %230 = vmatpush.msra.mxu2 %v191_v14  ;;  %v286_v28 = vperm.slane %v283_v26, 2  ;;  %v284_v34 = vperm.slane %v283_v26, 0  ;;  %v285_v45 = vperm.slane %v283_v26, 1 }
  0x29   :  { %250 = vmatpush.msra.mxu3 %v192_v15 }
  0x2a   :  { %270 = vmatpush.msrb.mxu0 %v193_v16  ;;  %vm289_vm4 = vcmp.eq.s32.totalorder %v286_v28, 1  ;;  %vm287_vm5 = vcmp.eq.s32.totalorder %v284_v34, 1  ;;  %vm288_vm6 = vcmp.eq.s32.totalorder %v285_v45, 1 }
  0x9e   :  { %v158_v17 = vpop.f32.mrf.mxu0 }
  0xa0   :  { %v182_v19 = vpop.f32.mrf.mxu1 }
  0xa1   :  { %v183_v20 = vadd.f32 %v182_v19, %v158_v17 }
  0xa3   :  { %v189_v21 = vadd.f32 %v364_v18, %v183_v20 }
  0xa5   :  { %v190_v22 = vmax.f32 %v189_v21, 0.0 }
  0xa7   :  { %348 = vmatmul.msk.f32.vlgmr.msra.gmra.mxu2 %vm211_vm2, %v190_v22  ;;  %349 = vmatmul.msk.f32.vlgmr.msra.gmra.mxu3 %vm211_vm2, %v190_v22 }
  0xa8   :  { %350 = vmatmul.msk.f32.vlgmr.msrb.gmra.mxu0 %vm211_vm2, %v190_v22 }
 0x125   :  { %v272_v29 = vpop.f32.mrf.mxu0 }
 0x126   :  { %v273_v31 = vadd.f32 %v272_v29, %v207_v27 }
 0x128   :  { %v280_v33 = vadd.f32 %v277_v30, %v273_v31 }
 0x12a   :  { %v292_v35 = vsel %vm289_vm4, %v280_v33, -1e+30  ;;  %v232_v36 = vpop.f32.mrf.mxu2  ;;  %v252_v40 = vpop.f32.mrf.mxu3 }
 0x12b   :  { %315 = vmax.xlane.f32.xlu1 %v292_v35  ;;  %v233_v38 = vadd.f32 %v232_v36, %v205_v32  ;;  %v253_v42 = vadd.f32 %v252_v40, %v206_v39 }
 0x12d   :  { %v278_v41 = vadd.f32 %v275_v37, %v233_v38  ;;  %v279_v46 = vadd.f32 %v276_v44, %v253_v42 }
 0x12f   :  { %v290_v43 = vsel %vm287_vm5, %v278_v41, -1e+30  ;;  %v291_v47 = vsel %vm288_vm6, %v279_v46, -1e+30 }
 0x130   :  { %293 = vmax.xlane.f32.xlu0 %v290_v43 }
 0x138   :  { %304 = vmax.xlane.f32.xlu0 %v291_v47 }
 0x19e   :  { %v316_v53 = vpop.xlane.xlu1 %315 }
 0x19f   :  { %v317_v56 = vsub.f32 %v292_v35, %v316_v53 }
 0x1a1   :  { %v318_v57 = vmul.f32 1.442695, %v317_v56 }
 0x1a3   :  { %v294_v48 = vpop.xlane.xlu0 %293 }
 0x1a4   :  { %v295_v49 = vsub.f32 %v290_v43, %v294_v48 }
 0x1a6   :  { %v296_v50 = vmul.f32 1.442695, %v295_v49 }
 0x1a8   :  { %365 = vpow2.f32 %v296_v50 }
 0x1ab   :  { %v305_v51 = vpop.xlane.xlu0 %304 }
 0x1ac   :  { %v306_v52 = vsub.f32 %v291_v47, %v305_v51 }
 0x1ae   :  { %v366_v54 = vpop.eup %365  ;;  %v307_v55 = vmul.f32 1.442695, %v306_v52 }
 0x1af   :  { %298 = vadd.xlane.f32.xlu1 %v366_v54 }
 0x1b0   :  { %367 = vpow2.f32 %v307_v55 }
 0x1b1   :  { %369 = vpow2.f32 %v318_v57 }
 0x1b6   :  { %v368_v58 = vpop.eup %367 }
 0x1b7   :  { %309 = vadd.xlane.f32.xlu2 %v368_v58  ;;  %v370_v59 = vpop.eup %369 }
 0x1bf   :  { %320 = vadd.xlane.f32.xlu2 %v370_v59 }
 0x222   :  { %v299_v60 = vpop.xlane.xlu1 %298 }
 0x223   :  { %371 = vlog2.f32 %v299_v60 }
 0x229   :  { %v372_v61 = vpop.eup %371 }
 0x22a   :  { %v301_v62 = vmul.f32 0.6931472, %v372_v61  ;;  %v310_v63 = vpop.xlane.xlu2 %309 }
 0x22b   :  { %373 = vlog2.f32 %v310_v63 }
 0x22c   :  { %v302_v0 = vsub.f32 %v295_v49, %v301_v62 }
 0x22e   :  { %303 = vst [vmem:[#allocation14] sm:$0xff] %v302_v0 }
 0x231   :  { %v374_v1 = vpop.eup %373 }
 0x232   :  { %v312_v2 = vmul.f32 0.6931472, %v374_v1  ;;  %v321_v3 = vpop.xlane.xlu2 %320 }
 0x233   :  { %375 = vlog2.f32 %v321_v3 }
 0x234   :  { %v313_v4 = vsub.f32 %v306_v52, %v312_v2 }
 0x236   :  { %314 = vst [vmem:[#allocation14 + $0x8] sm:$0xff] %v313_v4 }
 0x239   :  { %v376_v5 = vpop.eup %375 }
 0x23a   :  { %v323_v6 = vmul.f32 0.6931472, %v376_v5 }
 0x23c   :  { %v324_v7 = vsub.f32 %v317_v56, %v323_v6 }
 0x23e   :  { %325 = vst [vmem:[#allocation14 + $0x10] sm:$0xff] %v324_v7 }
 0x23f   :  { %336 = dma.vmem_to_hbm [thread:$0]  %s332_s8, 384, %s334_s25, [#allocation4]  }
 0x240   :  { %577 = dma.done.wait [#allocation4], 384  }
 0x241   :  { %578 = vsyncadd [#allocation4], 4294966912 }
 0x242   :  { %341 = vsyncpa [#allocation3], 1 }
 0x243   :  { %342 = vsyncpa [#allocation6], 1 }
 0x244   :  { %343 = vsyncpa [#allocation9], 1 }
 0x245   :  { %344 = vsyncpa [#allocation12], 1 }
 0x246   :  { %345 = vsyncpa [#allocation4], 1 }

</bundles_post_ra>
